<compile_context>
chip_gen: v7x
topology: tpu7x:2x2x1
jax: 0.10.0
libtpu: 0.0.40
codegen_flags: <defaults>
</compile_context>

<pallas_src>
import jax
import jax.numpy as jnp
from jax.experimental import pallas as pl
from jax.experimental.pallas import tpu as pltpu


def _resblock_kernel(x_ref, w1_ref, b1_ref, w2_ref, b2_ref, o_ref):
    # x_ref  : (Nb, H, W*C)   lane-dense activation slab (Nb images)
    # w*_ref : (3*W*C, W*C)   block-banded conv weights (bf16 or f32)
    # b*_ref : (1, W*C)       conv bias tiled across W (f32)
    # o_ref  : (Nb, H, W*C)   output slab
    nb, h, wc = o_ref.shape
    mxu_dtype = w1_ref.dtype
    zrow = jnp.zeros((nb, 1, wc), jnp.float32)   # shared zero pad row (hoisted)

    def conv3x3(v, w_ref, b_ref):
        """SAME 3x3 conv of v (Nb, H, W*C) f32 -> (Nb, H, W*C) f32 (+ bias).

        Row taps (dy) are sublane shifts with zero padding; column taps (dx)
        and SAME column padding live inside the block-banded weight matrix,
        so the whole conv is one MXU matmul on lane-dense slabs.
        """
        up = jnp.concatenate([zrow, v[:, :-1, :]], axis=1)    # rows y-1 (dy=0)
        dn = jnp.concatenate([v[:, 1:, :], zrow], axis=1)     # rows y+1 (dy=2)
        patches = jnp.concatenate([up, v, dn], axis=-1)       # (Nb, H, 3*W*C)
        patches = patches.reshape(nb * h, 3 * wc).astype(mxu_dtype)
        acc = jnp.dot(patches, w_ref[...],
                      preferred_element_type=jnp.float32)     # (Nb*H, W*C)
        return (acc + b_ref[...]).reshape(nb, h, wc)

    x = x_ref[...].astype(jnp.float32)
    hid = jnp.maximum(conv3x3(x, w1_ref, b1_ref), 0.0)         # conv1 + ReLU (f32)
    y = conv3x3(hid, w2_ref, b2_ref)                           # conv2 (f32)
    y = y + x_ref[...].astype(jnp.float32)                     # skip = Identity (late re-read)
    o_ref[...] = y.astype(o_ref.dtype)                         # full-lane (Nb,H,W*C) store


def _banded_conv_weights(w_hwio, width):
    """(3, 3, C, C) HWIO -> (3*W*C, W*C) block-banded matrix.

    Row index = dy*W*C + x_in*C + c_in   (dy in {0,1,2} selects input row y-1+dy)
    Col index =          x_out*C + c_out
    Entry     = w[dy, x_in - x_out + 1, c_in, c_out] if |x_in - x_out| <= 1 else 0
    The band implements both the dx taps and SAME column padding, so the kernel
    never shuffles channels across lanes.
    """
    c = w_hwio.shape[2]
    x_in = jnp.arange(width)[:, None]
    x_out = jnp.arange(width)[None, :]
    dx = x_in - x_out + 1
    valid = (dx >= 0) & (dx <= 2)
    band = w_hwio[:, jnp.clip(dx, 0, 2), :, :]                  # (3, Win, Wout, C, C)
    band = band * valid[None, :, :, None, None].astype(w_hwio.dtype)
    band = band.transpose(0, 1, 3, 2, 4)                        # (dy, x_in, c_in, x_out, c_out)
    return band.reshape(3 * width * c, width * c)


def resblock_pallas_nhwc(x_nhwc, w1, b1, w2, b2, *,
                         mxu_dtype=jnp.bfloat16, batch_block=None):
    """ResBlock forward, NHWC. w*: (3, 3, C, C) HWIO; b*: (C,)."""
    n, h, w, c = x_nhwc.shape
    wc = w * c

    if batch_block is None:
        # Largest block that still leaves >= 8 grid steps (4 per TensorCore on
        # 2-TC v7x) so the BlockSpec pipeline can hide the I/O DMA; small N
        # falls back to one image per step.
        batch_block = next((nb for nb in range(min(n, 8), 0, -1)
                            if n % nb == 0 and n // nb >= 8), 1)
    if n % batch_block != 0:
        raise ValueError("batch_block must divide N")

    # Free view: NHWC -> lane-dense (N, H, W*C) slabs (last dim maps to lanes).
    x_slab = x_nhwc.reshape(n, h, wc)

    # Block-banded weights built once on the host side; MXU operands bf16 by
    # default (f32 accumulation).  Biases tiled across W, kept f32.
    w1m = _banded_conv_weights(w1, w).astype(mxu_dtype)
    w2m = _banded_conv_weights(w2, w).astype(mxu_dtype)
    b1m = jnp.tile(b1.astype(jnp.float32), w).reshape(1, wc)
    b2m = jnp.tile(b2.astype(jnp.float32), w).reshape(1, wc)

    itemsize = jnp.dtype(x_nhwc.dtype).itemsize
    mxu_itemsize = jnp.dtype(mxu_dtype).itemsize

    # Advisory cost estimate (useful FLOPs: 2 convs x 2 flops/MAC).
    cost = pl.CostEstimate(
        flops=int(4 * n * h * w * 9 * c * c),
        transcendentals=0,
        bytes_accessed=int(2 * n * h * wc * itemsize
                           + 2 * (3 * wc * wc) * mxu_itemsize + 2 * wc * 4))

    # Scoped-VMEM footprint: double-buffered in/out blocks + double-buffered
    # weights/biases + in-kernel f32 activations and patch temporaries.  Only
    # raise the limit when it exceeds the smallest per-generation default
    # (v5e: 16 MiB); at larger shapes v7x (64 MiB physical) needs the row-block
    # tiling TODO instead of a bigger limit.
    blk_bytes = batch_block * h * wc * itemsize
    weight_bytes = 2 * (3 * wc * wc) * mxu_itemsize + 2 * wc * 4
    interm_bytes = (batch_block * h * (3 * wc) * (4 + mxu_itemsize)
                    + 3 * batch_block * h * wc * 4)
    footprint = 4 * blk_bytes + 2 * weight_bytes + interm_bytes
    compiler_kwargs = dict(dimension_semantics=("parallel",))
    if footprint > 16 * 1024 * 1024:
        compiler_kwargs["vmem_limit_bytes"] = int(min(1.5 * footprint,
                                                      96 * 1024 * 1024))

    out_slab = pl.pallas_call(
        _resblock_kernel,
        out_shape=jax.ShapeDtypeStruct((n, h, wc), x_nhwc.dtype),
        grid=(n // batch_block,),
        in_specs=[
            pl.BlockSpec((batch_block, h, wc), lambda i: (i, 0, 0)),  # x slab
            pl.BlockSpec((3 * wc, wc), lambda i: (0, 0)),             # w1 (banded)
            pl.BlockSpec((1, wc), lambda i: (0, 0)),                  # b1
            pl.BlockSpec((3 * wc, wc), lambda i: (0, 0)),             # w2 (banded)
            pl.BlockSpec((1, wc), lambda i: (0, 0)),                  # b2
        ],
        out_specs=pl.BlockSpec((batch_block, h, wc), lambda i: (i, 0, 0)),
        compiler_params=pltpu.CompilerParams(**compiler_kwargs),
        cost_estimate=cost,
    )(x_slab, w1m, b1m, w2m, b2m)

    return out_slab.reshape(n, h, w, c)


def resblock_pallas(x_nchw, w1, b1, w2, b2, *,
                    mxu_dtype=jnp.bfloat16, batch_block=None):
    """PyTorch-interface adapter: x_nchw (N, C, H, W) -> (N, C, H, W)."""
    x_nhwc = jnp.transpose(x_nchw, (0, 2, 3, 1))
    out = resblock_pallas_nhwc(x_nhwc, w1, b1, w2, b2,
                               mxu_dtype=mxu_dtype, batch_block=batch_block)
    return jnp.transpose(out, (0, 3, 1, 2))


def _reference_resblock(x_nchw, w1, b1, w2, b2):
    """Pure-JAX reference (same math as the PyTorch module instantiation)."""
    x = jnp.transpose(x_nchw, (0, 2, 3, 1))
    dn = ('NHWC', 'HWIO', 'NHWC')
    h = jax.lax.conv_general_dilated(x, w1, (1, 1), 'SAME',
                                     dimension_numbers=dn) + b1
    h = jnp.maximum(h, 0.0)
    h = jax.lax.conv_general_dilated(h, w2, (1, 1), 'SAME',
                                     dimension_numbers=dn) + b2
    out = h + x  # skip = Identity
    return jnp.transpose(out, (0, 3, 1, 2))


if __name__ == "__main__":
    # Small shapes: batch=2, channels=8, spatial=16 (NCHW, like PyTorch).
    # W * C = 128 -> exactly one full lane group for the slab layout.
    N, C, H, W = 2, 8, 16, 16
    key = jax.random.PRNGKey(0)
    kx, kw1, kb1, kw2, kb2 = jax.random.split(key, 5)

    x = jax.random.normal(kx, (N, C, H, W), dtype=jnp.float32)
    scale = 1.0 / jnp.sqrt(9.0 * C)
    w1 = jax.random.normal(kw1, (3, 3, C, C), dtype=jnp.float32) * scale
    b1 = jax.random.normal(kb1, (C,), dtype=jnp.float32) * 0.1
    w2 = jax.random.normal(kw2, (3, 3, C, C), dtype=jnp.float32) * scale
    b2 = jax.random.normal(kb2, (C,), dtype=jnp.float32) * 0.1

    ref = jax.block_until_ready(_reference_resblock(x, w1, b1, w2, b2))

    # 1) Exact-math path (f32 MXU operands) vs lax.conv reference.
    #    (If a future generation lowers the default-precision f32 dot to a
    #    reduced-precision multi-pass product, pass precision=HIGHEST there.)
    out_f32 = jax.block_until_ready(
        resblock_pallas(x, w1, b1, w2, b2, mxu_dtype=jnp.float32))
    assert out_f32.shape == (N, C, H, W)
    assert jnp.allclose(out_f32, ref, atol=1e-3, rtol=1e-3), "f32 path mismatch"

    # 2) Fast path (default): bf16 MXU operands, f32 accumulation/elementwise.
    out_bf16 = jax.block_until_ready(resblock_pallas(x, w1, b1, w2, b2))
    assert out_bf16.shape == (N, C, H, W)
    assert jnp.allclose(out_bf16, ref, atol=5e-2, rtol=5e-2), "bf16 path mismatch"

    print("KERNEL_OK")
</pallas_src>

<mosaic_0001>
module attributes {stable_mosaic.version = 11 : i64} {
  func.func @_resblock_kernel(%arg0: i32, %arg1: memref<1x16x128xf32, #tpu.memory_space<vmem>>, %arg2: memref<384x128xf32, #tpu.memory_space<vmem>>, %arg3: memref<1x128xf32, #tpu.memory_space<vmem>>, %arg4: memref<384x128xf32, #tpu.memory_space<vmem>>, %arg5: memref<1x128xf32, #tpu.memory_space<vmem>>, %arg6: memref<1x16x128xf32, #tpu.memory_space<vmem>>) attributes {dimension_semantics = [#tpu.dimension_semantics<parallel>], iteration_bounds = array<i64: 2>, scalar_prefetch = 0 : i64, scratch_operands = 0 : i64, tpu.core_type = #tpu.core_type<tc>, window_params = [{transform_indices = @transform_0, window_bounds = array<i64: 1, 16, 128>}, {pipeline_mode = #tpu.pipeline_mode<synchronous>, transform_indices = @transform_1, window_bounds = array<i64: 384, 128>}, {pipeline_mode = #tpu.pipeline_mode<synchronous>, transform_indices = @transform_2, window_bounds = array<i64: 1, 128>}, {pipeline_mode = #tpu.pipeline_mode<synchronous>, transform_indices = @transform_3, window_bounds = array<i64: 384, 128>}, {pipeline_mode = #tpu.pipeline_mode<synchronous>, transform_indices = @transform_4, window_bounds = array<i64: 1, 128>}, {transform_indices = @transform_5, window_bounds = array<i64: 1, 16, 128>}]} {
    %cst = arith.constant 0.000000e+00 : f32
    %0 = vector.broadcast %cst : f32 to vector<1x1x128xf32>
    %c0 = arith.constant 0 : index
    %c0_0 = arith.constant 0 : index
    %c0_1 = arith.constant 0 : index
    %1 = vector.load %arg1[%c0, %c0_0, %c0_1] : memref<1x16x128xf32, #tpu.memory_space<vmem>>, vector<1x16x128xf32>
    %2 = vector.extract_strided_slice %1 {offsets = [0, 0, 0], sizes = [1, 15, 128], strides = [1, 1, 1]} : vector<1x16x128xf32> to vector<1x15x128xf32>
    %3 = tpu.concatenate %0, %2 in 1 : vector<1x1x128xf32>, vector<1x15x128xf32> -> vector<1x16x128xf32>
    %4 = vector.extract_strided_slice %1 {offsets = [0, 1, 0], sizes = [1, 15, 128], strides = [1, 1, 1]} : vector<1x16x128xf32> to vector<1x15x128xf32>
    %5 = tpu.concatenate %4, %0 in 1 : vector<1x15x128xf32>, vector<1x1x128xf32> -> vector<1x16x128xf32>
    %6 = tpu.concatenate %3, %1, %5 in 2 : vector<1x16x128xf32>, vector<1x16x128xf32>, vector<1x16x128xf32> -> vector<1x16x384xf32>
    %7 = vector.shape_cast %6 : vector<1x16x384xf32> to vector<16x384xf32>
    %c0_2 = arith.constant 0 : index
    %c0_3 = arith.constant 0 : index
    %8 = vector.load %arg2[%c0_2, %c0_3] : memref<384x128xf32, #tpu.memory_space<vmem>>, vector<384x128xf32>
    %cst_4 = arith.constant dense<0.000000e+00> : vector<16x128xf32>
    %9 = tpu.matmul %7, %8, %cst_4 {dimension_numbers = #tpu.dot_dimension_numbers<[1], [0], [0], [1], [0, 0, 1, 1], [], []>} : vector<16x384xf32>, vector<384x128xf32>, vector<16x128xf32> -> vector<16x128xf32>
    %c0_5 = arith.constant 0 : index
    %c0_6 = arith.constant 0 : index
    %10 = vector.load %arg3[%c0_5, %c0_6] : memref<1x128xf32, #tpu.memory_space<vmem>>, vector<1x128xf32>
    %11 = vector.broadcast %10 : vector<1x128xf32> to vector<16x128xf32>
    %12 = arith.addf %9, %11 : vector<16x128xf32>
    %13 = vector.shape_cast %12 : vector<16x128xf32> to vector<1x16x128xf32>
    %cst_7 = arith.constant 0.000000e+00 : f32
    %14 = vector.broadcast %cst_7 : f32 to vector<1x16x128xf32>
    %15 = arith.maximumf %13, %14 : vector<1x16x128xf32>
    %16 = vector.extract_strided_slice %15 {offsets = [0, 0, 0], sizes = [1, 15, 128], strides = [1, 1, 1]} : vector<1x16x128xf32> to vector<1x15x128xf32>
    %17 = tpu.concatenate %0, %16 in 1 : vector<1x1x128xf32>, vector<1x15x128xf32> -> vector<1x16x128xf32>
    %18 = vector.extract_strided_slice %15 {offsets = [0, 1, 0], sizes = [1, 15, 128], strides = [1, 1, 1]} : vector<1x16x128xf32> to vector<1x15x128xf32>
    %19 = tpu.concatenate %18, %0 in 1 : vector<1x15x128xf32>, vector<1x1x128xf32> -> vector<1x16x128xf32>
    %20 = tpu.concatenate %17, %15, %19 in 2 : vector<1x16x128xf32>, vector<1x16x128xf32>, vector<1x16x128xf32> -> vector<1x16x384xf32>
    %21 = vector.shape_cast %20 : vector<1x16x384xf32> to vector<16x384xf32>
    %c0_8 = arith.constant 0 : index
    %c0_9 = arith.constant 0 : index
    %22 = vector.load %arg4[%c0_8, %c0_9] : memref<384x128xf32, #tpu.memory_space<vmem>>, vector<384x128xf32>
    %cst_10 = arith.constant dense<0.000000e+00> : vector<16x128xf32>
    %23 = tpu.matmul %21, %22, %cst_10 {dimension_numbers = #tpu.dot_dimension_numbers<[1], [0], [0], [1], [0, 0, 1, 1], [], []>} : vector<16x384xf32>, vector<384x128xf32>, vector<16x128xf32> -> vector<16x128xf32>
    %c0_11 = arith.constant 0 : index
    %c0_12 = arith.constant 0 : index
    %24 = vector.load %arg5[%c0_11, %c0_12] : memref<1x128xf32, #tpu.memory_space<vmem>>, vector<1x128xf32>
    %25 = vector.broadcast %24 : vector<1x128xf32> to vector<16x128xf32>
    %26 = arith.addf %23, %25 : vector<16x128xf32>
    %27 = vector.shape_cast %26 : vector<16x128xf32> to vector<1x16x128xf32>
    %c0_13 = arith.constant 0 : index
    %c0_14 = arith.constant 0 : index
    %c0_15 = arith.constant 0 : index
    %28 = vector.load %arg1[%c0_13, %c0_14, %c0_15] : memref<1x16x128xf32, #tpu.memory_space<vmem>>, vector<1x16x128xf32>
    %29 = arith.addf %27, %28 : vector<1x16x128xf32>
    %c0_16 = arith.constant 0 : index
    %c0_17 = arith.constant 0 : index
    %c0_18 = arith.constant 0 : index
    %30 = vector.load %arg6[%c0_16, %c0_17, %c0_18] : memref<1x16x128xf32, #tpu.memory_space<vmem>>, vector<1x16x128xf32>
    tpu.vector_store %arg6[%c0_16, %c0_17, %c0_18], %29 {strides = array<i32>} : memref<1x16x128xf32, #tpu.memory_space<vmem>>, vector<1x16x128xf32>,
    return
  }
  func.func @transform_0(%arg0: i32) -> (i32, i32, i32) {
    %c0_i32 = arith.constant 0 : i32
    %c0_i32_0 = arith.constant 0 : i32
    %c0_i32_1 = arith.constant 0 : i32
    return %arg0, %c0_i32, %c0_i32_0 : i32, i32, i32
  }
  func.func @transform_1(%arg0: i32) -> (i32, i32) {
    %c0_i32 = arith.constant 0 : i32
    %c0_i32_0 = arith.constant 0 : i32
    %c0_i32_1 = arith.constant 0 : i32
    return %c0_i32, %c0_i32_0 : i32, i32
  }
  func.func @transform_2(%arg0: i32) -> (i32, i32) {
    %c0_i32 = arith.constant 0 : i32
    %c0_i32_0 = arith.constant 0 : i32
    %c0_i32_1 = arith.constant 0 : i32
    return %c0_i32, %c0_i32_0 : i32, i32
  }
  func.func @transform_3(%arg0: i32) -> (i32, i32) {
    %c0_i32 = arith.constant 0 : i32
    %c0_i32_0 = arith.constant 0 : i32
    %c0_i32_1 = arith.constant 0 : i32
    return %c0_i32, %c0_i32_0 : i32, i32
  }
  func.func @transform_4(%arg0: i32) -> (i32, i32) {
    %c0_i32 = arith.constant 0 : i32
    %c0_i32_0 = arith.constant 0 : i32
    %c0_i32_1 = arith.constant 0 : i32
    return %c0_i32, %c0_i32_0 : i32, i32
  }
  func.func @transform_5(%arg0: i32) -> (i32, i32, i32) {
    %c0_i32 = arith.constant 0 : i32
    %c0_i32_0 = arith.constant 0 : i32
    %c0_i32_1 = arith.constant 0 : i32
    return %arg0, %c0_i32, %c0_i32_0 : i32, i32, i32
  }
}

</mosaic_0001>

<bundles_post_ra>
// kernel: tpu_custom_call.1
= control target key start
LH: loop header
LB: loop body
LE: loop exit
PB: predicated region body
PF: predicated region fallthrough
CT: control target
= control target key end

     0   :  { %10 = vsyncpa [#allocation3], 0  ;;  %s1719_s0 = inlined_call_operand.hbm [shape: f32[2,16,128], index: 0, kind: input, shape index: {}]   ;;  %s1720_s1 = inlined_call_operand.hbm [shape: f32[384,128], index: 1, kind: input, shape index: {}]   ;;  %s1721_s2 = inlined_call_operand.vmem [shape: f32[1,128], index: 2, kind: input, shape index: {}]   ;;  %s1722_s3 = inlined_call_operand.hbm [shape: f32[384,128], index: 3, kind: input, shape index: {}]   ;;  %s1723_s4 = inlined_call_operand.vmem [shape: f32[1,128], index: 4, kind: input, shape index: {}]   ;;  %s1724_s5 = inlined_call_operand.hbm [shape: f32[2,16,128], index: 5, kind: output, shape index: {}]  }
   0x1   :  { %12 = vsyncpa [#allocation3 + $0x1], 0 }
   0x2   :  { %13 = vsyncpa [#allocation6], 0 }
   0x3   :  { %14 = vsyncpa [#allocation4], 0 }
   0x4   :  { %16 = vsyncpa [#allocation4 + $0x1], 0  ;;  %s1431_s18 = smov 0   ;;  %s1433_s19 = smov 0  }
   0x5   :  { %s1435_s20 = smov 0   ;;  %s1437_s21 = smov 0  }
   0x6 LB: > { %s1452_s22 = sadd.s32 4294967295, %s1391_s21   ;;  %s826_s23 = sadd.s32 4294967294, %s1391_s21   ;;  %s1391_s21 = sphi %s1437_s21, %s1746_s21   ;;  %s1387_s20 = sphi %s1435_s20, %s1745_s20   ;;  %s1383_s19 = sphi %s1433_s19, %s1744_s19   ;;  %s1379_s18 = sphi %s1431_s18, %s1743_s18  }
   0x7   : > { %p42_p0 = scmp.ne.s32.totalorder %s1383_s19, %s1379_s18  ;;  %p1725_p1 = scmp.eq.s32.totalorder %s1452_s22, 0 }
   0x8   : > { %p156_p3 = scmp.eq.s32.totalorder %s826_s23, 1  ;;  %p827_p5 = scmp.ge.s32.totalorder %s1391_s21, 1 }
   0x9   : > { %p1461_p4 = por %p1725_p1, %p42_p0  ;;  %p163_p7 = scmp.lt.s32.totalorder %s1391_s21, 3 }
   0xa   : > { %p1466_p6 = por %p156_p3, %p42_p0  ;;  %s1393_s27 = smov [#allocation5]  }
   0xb   : > { %s1728_s24 = scalar_select %p1461_p4, 1, 0 }
   0xc   : > { %s1729_s25 = scalar_select %p1466_p6, 1, 0 }
   0xd   : > { %p1471_p8 = pnand %p827_p5, %p163_p7  ;;  %s175_s28 = sshll.u32 %s1393_s27, 4  ;;  %s1475_s28 = int_to_ptr.vmem [resolvable:$true] %s175_s28 }
   0xe   : > { %s1394_s30 = smov [#allocation7]   ;;  %s1235_s9 = scalar_lea.hbm %s1720_s1, 6144 }
   0xf   : > { %p1176_p9 = pneg %p1471_p8  ;;  %s191_s6 = sshll.u32 %s1394_s30, 4  ;;  %s1486_s6 = int_to_ptr.vmem [resolvable:$true] %s191_s6 }
  0x10   : > { %p1236_p12 = scmp.ne.s32.totalorder %s1720_s1, %s1235_s9  ;;  %p1242_p5 = scmp.lt.u32.totalorder %s1235_s9, %s1720_s1 }
  0x11   : > { %p1482_p11 = pnand %p1176_p9, %p1725_p1 }
  0x13   : > { %p1237_p13 = pneg %p1482_p11 }
  0x15   : > { %p1238_p0 = pnand %p1237_p13, %p1236_p12 }
  0x17   : > { %p1239_p3 = pneg %p1238_p0 }
  0x19   : > { %p1244_p7 = pnand %p1242_p5, %p1239_p3 }
  0x1b   : > { %1247 = shalt.err (!%p1244_p7)
}
  0x1c   : > { %s1248_s14 = scalar_lea.vmem %s1475_s28, 6144  ;;  %p1256_p2 = scmp.lt.s32.totalorder %s1475_s28, %s1475_s28 }
  0x1d   : > { %p1249_p9 = scmp.ne.s32.totalorder %s1475_s28, %s1248_s14  ;;  %p1257_p12 = scmp.lt.s32.totalorder %s1248_s14, %s1248_s14 }
  0x1f   : > { %p1251_p10 = pnand %p1249_p9, %p1237_p13  ;;  %p1258_p0 = por %p1257_p12, %p1256_p2 }
  0x21   : > { %p1252_p1 = pneg %p1251_p10 }
  0x23   : > { %p1259_p6 = pnand %p1258_p0, %p1252_p1 }
  0x25   : > { %1262 = shalt.err (!%p1259_p6)
}
  0x26   : > { %s1395_s15 = smov 128   ;;  %s1396_s16 = smov 8  }
  0x27   : > { %1179 = dma.hbm_to_vmem [thread:$0]  (!%p1482_p11), %s1720_s1, 6144, %s1475_s28, [#allocation6], %s1395_s15, %s1395_s15, %s1396_s16  }
  0x28   : > { %s1263_s7 = scalar_lea.hbm %s1722_s3, 6144 }
  0x29   : > { %p1264_p1 = scmp.ne.s32.totalorder %s1722_s3, %s1263_s7  ;;  %p1270_p10 = scmp.lt.u32.totalorder %s1263_s7, %s1722_s3 }
  0x2b   : > { %p1266_p2 = pnand %p1264_p1, %p1237_p13 }
  0x2d   : > { %p1267_p6 = pneg %p1266_p2 }
  0x2f   : > { %p1272_p3 = pnand %p1270_p10, %p1267_p6 }
  0x31   : > { %1275 = shalt.err (!%p1272_p3)
}
  0x32   : > { %s1276_s28 = scalar_lea.vmem %s1486_s6, 6144  ;;  %p1284_p12 = scmp.lt.s32.totalorder %s1486_s6, %s1486_s6 }
  0x33   : > { %p1277_p5 = scmp.ne.s32.totalorder %s1486_s6, %s1276_s28  ;;  %p1285_p0 = scmp.lt.s32.totalorder %s1276_s28, %s1276_s28 }
  0x35   : > { %p1279_p7 = pnand %p1277_p5, %p1237_p13  ;;  %p1286_p1 = por %p1285_p0, %p1284_p12 }
  0x37   : > { %p1280_p9 = pneg %p1279_p7 }
  0x39   : > { %p1287_p2 = pnand %p1286_p1, %p1280_p9 }
  0x3b   : > { %1290 = shalt.err (!%p1287_p2)
}
  0x3c   : > { %1182 = dma.hbm_to_vmem [thread:$0]  (!%p1482_p11), %s1722_s3, 6144, %s1486_s6, [#allocation6], %s1395_s15, %s1395_s15, %s1396_s16  }
  0x3d   : > { %s1547_s29 = sadd.s32 1, %s1391_s21   ;;  %s29_s14 = sadd.s32 1, %s1387_s20 }
  0x3e   : > { %s26_s17 = ssub.s32 %s1391_s21, %s1547_s29  ;;  %p36_p13 = scmp.ne.s32.totalorder %s1387_s20, %s1383_s19 }
  0x3f   : > { %p27_p6 = scmp.eq.s32.totalorder %s26_s17, 0  ;;  %p37_p10 = scmp.eq.s32.totalorder %s1391_s21, 0 }
  0x40   : > { %p1732_p3 = scmp.eq.s32.totalorder %s1452_s22, 1  ;;  %p1193_p7 = scmp.lt.s32.totalorder %s1391_s21, 2 }
  0x41   : > { %s1563_s27 = scalar_select %p27_p6, %s1387_s20, %s29_s14  }
  0x42   : > { %p1557_p5 = por %p1732_p3, %p36_p13  ;;  %p38_p9 = por %p37_p10, %p36_p13 }
  0x43   : > { %s208_s30 = sand.u32 1, %s1387_s20   ;;  %s852_s6 = sshll.u32 %s1391_s21, 8 }
  0x44   : > { %s1733_s23 = scalar_select %p1557_p5, 1, 0 }
  0x45   : > { %s831_s7 = sshll.u32 %s208_s30, 4  ;;  %s1570_s10 = scalar_lea.hbm %s1719_s0, %s852_s6 }
  0x46   : > { %s212_s11 = scalar_lea.vmem [#allocation2], %s831_s7  ;;  %p1574_p11 = pnand %p1193_p7, %p38_p9 }
  0x47   : > { %s219_s28 = sshll.u32 %s212_s11, 4  ;;  %s1578_s13 = scalar_lea.sflag [#allocation3], %s208_s30  ;;  %s1572_s28 = int_to_ptr.vmem [resolvable:$true] %s219_s28 }
  0x48   : > { %s1291_s14 = scalar_lea.hbm %s1570_s10, 256  ;;  %p1293_p0 = pneg %p1574_p11 }
  0x49   : > { %p1292_p12 = scmp.ne.s32.totalorder %s1570_s10, %s1291_s14  ;;  %s1296_s6 = scalar_lea.hbm %s1719_s0, 512 }
  0x4a   : > { %p1297_p13 = scmp.lt.u32.totalorder %s1570_s10, %s1719_s0  ;;  %p1298_p6 = scmp.lt.u32.totalorder %s1296_s6, %s1291_s14 }
  0x4b   : > { %p1294_p1 = pnand %p1293_p0, %p1292_p12  ;;  %p1300_p3 = scmp.lt.u32.totalorder %s1291_s14, %s1570_s10 }
  0x4c   : > { %p1299_p10 = por %p1298_p6, %p1297_p13 }
  0x4d   : > { %p1295_p2 = pneg %p1294_p1 }
  0x4e   : > { %p1301_p7 = por %p1300_p3, %p1299_p10 }
  0x50   : > { %p1302_p9 = pnand %p1301_p7, %p1295_p2 }
  0x52   : > { %1305 = shalt.err (!%p1302_p9)
}
  0x53   : > { %s1306_s30 = scalar_lea.vmem %s1572_s28, 256  ;;  %s1397_s11 = smov [#allocation2]  }
  0x54   : > { %p1307_p12 = scmp.ne.s32.totalorder %s1572_s28, %s1306_s30  ;;  %s1311_s17 = sshll.u32 %s1397_s11, 4  ;;  %s1312_s17 = int_to_ptr.vmem [resolvable:$false] %s1311_s17 }
  0x55   : > { %s1313_s7 = scalar_lea.vmem %s1312_s17, 512  ;;  %p1314_p4 = scmp.lt.s32.totalorder %s1572_s28, %s1312_s17 }
  0x56   : > { %p1309_p1 = pnand %p1307_p12, %p1293_p0  ;;  %p1315_p13 = scmp.lt.s32.totalorder %s1313_s7, %s1306_s30 }
  0x58   : > { %p1310_p5 = pneg %p1309_p1  ;;  %p1316_p6 = por %p1315_p13, %p1314_p4 }
  0x5a   : > { %p1317_p10 = pnand %p1316_p6, %p1310_p5 }
  0x5c   : > { %1320 = shalt.err (!%p1317_p10)
}
  0x5d   : > { %1186 = dma.hbm_to_vmem [thread:$0]  (!%p1574_p11), %s1570_s10, 256, %s1572_s28, %s1578_s13, %s1395_s15, %s1395_s15, %s1396_s16  }
  0x5e   : > { %231 = sbr.rel (%p1471_p8) target bundleno = 604 (0x25c), region = 40  ;;  %s1612_s14 = sand.u32 (!%p1471_p8), 1, %s1383_s19  }
  0x5f   : > { %s835_s6 = sshll.u32 (!%p1471_p8), %s1612_s14, 4  ;;  %s234_s8 = scalar_lea.sflag (!%p1471_p8), [#allocation3], %s1612_s14 }
  0x60   : > { %s1618_s12 = scalar_lea.vmem (!%p1471_p8), [#allocation2], %s835_s6  ;;  %p1735_p4 = scmp.ne.s32.totalorder (!%p1471_p8), %s1728_s24, 0 }
  0x65   : > { %1366 = dma.done.wait (%p1735_p4), %s234_s8, 256  }
  0x66   : > { %1368 = vsyncadd (%p1735_p4), %s234_s8, 4294967040  ;;  %p1736_p5 = scmp.eq.s32.totalorder %s1452_s22, 0 }
  0x68   : > { %1370 = dma.done.wait (%p1736_p5), [#allocation6], 12288   ;;  %p1737_p8 = pmov %p1736_p5 }
  0x69   : > { %v306_v0 = vld [vmem:[#allocation5 + $0x80] sm:$0xff]  ;;  %v307_v1 = vld [vmem:[#allocation5 + $0x88] sm:$0xff]  ;;  %v308_v5 = vld [vmem:[#allocation5 + $0x90] sm:$0xff]  ;;  %vm283_vm0 = vcmask 1046528   ;;  %vm276_vm1 = vcmask 1040384   ;;  %s271_s10 = scalar_lea.vmem [#allocation8], %s835_s6 }
  0x6a   : > { %1372 = vsyncadd (%p1737_p8), [#allocation6], 4294955008  ;;  %v290_v2 = vld [vmem:[#allocation5] sm:$0xff]  ;;  %v1036_v3 = vpack.c.bf16 %v307_v1, %v306_v0  ;;  %v291_v4 = vld [vmem:[#allocation5 + $0x8] sm:$0xff]  ;;  %s734_s28 = sshll.u32 %s271_s10, 4  ;;  %s853_s13 = sshll.u32 %s1452_s22, 8  ;;  %s1669_s28 = int_to_ptr.vmem [resolvable:$true] %s734_s28 }
  0x6b   : > { %v309_v6 = vld [vmem:[#allocation5 + $0x98] sm:$0xff]  ;;  %v1038_v7 = vpack.c.bf16 %v291_v4, %v290_v2  ;;  %v322_v9 = vld [vmem:[#allocation5 + $0x100] sm:$0xff]  ;;  %v323_v10 = vld [vmem:[#allocation5 + $0x108] sm:$0xff]  ;;  %s1674_s11 = scalar_lea.hbm %s1724_s5, %s853_s13  ;;  %s721_s17 = scalar_lea.sflag [#allocation4], %s1612_s14 }
  0x6c   : > { %v1040_v8 = vpack.c.bf16 %v309_v6, %v308_v5  ;;  %v292_v11 = vld [vmem:[#allocation5 + $0x10] sm:$0xff]  ;;  %1037 = vmatprep.subr.bf16.mxu0 %v1036_v3  ;;  %v1068_v12 = vpack.c.bf16 %v323_v10, %v322_v9  ;;  %v293_v13 = vld [vmem:[#allocation5 + $0x18] sm:$0xff]  ;;  %v310_v14 = vld [vmem:[#allocation5 + $0xa0] sm:$0xff]  ;;  %s1321_s7 = scalar_lea.vmem %s1669_s28, 256  ;;  %p1740_p0 = scmp.ne.s32.totalorder %s1733_s23, 0 }
  0x6d   : > { %v311_v15 = vld [vmem:[#allocation5 + $0xa8] sm:$0xff]  ;;  %1039 = vmatpush3.bf16.msra.mxu0 %v1038_v7  ;;  %v1042_v16 = vpack.c.bf16 %v293_v13, %v292_v11  ;;  %v324_v17 = vld [vmem:[#allocation5 + $0x110] sm:$0xff]  ;;  %v325_v18 = vld [vmem:[#allocation5 + $0x118] sm:$0xff]  ;;  %p1322_p11 = scmp.ne.s32.totalorder %s1669_s28, %s1321_s7  ;;  %s1398_s22 = smov [#allocation8]  }
  0x6e   : > { %1041 = vmatprep.subr.bf16.mxu0 %v1040_v8  ;;  %1069 = vmatprep.subr.bf16.mxu1 %v1068_v12  ;;  %v1044_v19 = vpack.c.bf16 %v311_v15, %v310_v14  ;;  %v1072_v20 = vpack.c.bf16 %v325_v18, %v324_v17  ;;  %v294_v21 = vld [vmem:[#allocation5 + $0x20] sm:$0xff]  ;;  %v295_v22 = vld [vmem:[#allocation5 + $0x28] sm:$0xff]  ;;  %v312_v23 = vld [vmem:[#allocation5 + $0xb0] sm:$0xff]  ;;  %s1325_s6 = sshll.u32 %s1398_s22, 4  ;;  %s1326_s6 = int_to_ptr.vmem [resolvable:$false] %s1325_s6 }
  0x6f   : > { %1071 = vmatpush3.bf16.msra.mxu1 %v1068_v12  ;;  %v313_v24 = vld [vmem:[#allocation5 + $0xb8] sm:$0xff]  ;;  %v326_v25 = vld [vmem:[#allocation5 + $0x120] sm:$0xff]  ;;  %v327_v26 = vld [vmem:[#allocation5 + $0x128] sm:$0xff]  ;;  %v1046_v28 = vpack.c.bf16 %v295_v22, %v294_v21  ;;  %p1323_p2 = pnand %p1322_p11, %p1740_p0  ;;  %s1327_s8 = scalar_lea.vmem %s1326_s6, 512 }
  0x70   : > { %1073 = vmatprep.subr.bf16.mxu1 %v1072_v20  ;;  %v1076_v27 = vpack.c.bf16 %v327_v26, %v326_v25  ;;  %v328_v29 = vld [vmem:[#allocation5 + $0x130] sm:$0xff]  ;;  %v329_v30 = vld [vmem:[#allocation5 + $0x138] sm:$0xff]  ;;  %v1048_v31 = vpack.c.bf16 %v313_v24, %v312_v23  ;;  %v314_v34 = vld [vmem:[#allocation5 + $0xc0] sm:$0xff]  ;;  %p1328_p7 = scmp.lt.s32.totalorder %s1669_s28, %s1326_s6  ;;  %p1329_p9 = scmp.lt.s32.totalorder %s1327_s8, %s1321_s7 }
  0x71   : > { %1043 = vmatpush3.bf16.msra.mxu0 %v1042_v16  ;;  %v296_v32 = vld [vmem:[#allocation5 + $0x30] sm:$0xff]  ;;  %v297_v33 = vld [vmem:[#allocation5 + $0x38] sm:$0xff]  ;;  %v315_v35 = vld [vmem:[#allocation5 + $0xc8] sm:$0xff]  ;;  %v1080_v36 = vpack.c.bf16 %v329_v30, %v328_v29  ;;  %p1324_p3 = pneg %p1323_p2 }
  0x72   : > { %1045 = vmatprep.subr.bf16.mxu0 %v1044_v19  ;;  %v1050_v37 = vpack.c.bf16 %v297_v33, %v296_v32  ;;  %v330_v38 = vld [vmem:[#allocation5 + $0x140] sm:$0xff]  ;;  %v331_v39 = vld [vmem:[#allocation5 + $0x148] sm:$0xff]  ;;  %v1052_v40 = vpack.c.bf16 %v315_v35, %v314_v34  ;;  %v316_v43 = vld [vmem:[#allocation5 + $0xd0] sm:$0xff]  ;;  %p1330_p12 = por %p1329_p9, %p1328_p7 }
  0x73   : > { %1075 = vmatpush3.bf16.msra.mxu1 %v1072_v20  ;;  %v298_v41 = vld [vmem:[#allocation5 + $0x40] sm:$0xff]  ;;  %v299_v42 = vld [vmem:[#allocation5 + $0x48] sm:$0xff]  ;;  %v317_v44 = vld [vmem:[#allocation5 + $0xd8] sm:$0xff]  ;;  %v1084_v45 = vpack.c.bf16 %v331_v39, %v330_v38 }
  0x74   : > { %1077 = vmatprep.subr.bf16.mxu1 %v1076_v27  ;;  %v1629_v46 = vld [vmem:[%s1618_s12] sm:$0xff]  ;;  %v1054_v47 = vpack.c.bf16 %v299_v42, %v298_v41  ;;  %v333_v49 = vld [vmem:[#allocation5 + $0x158] sm:$0xff]  ;;  %v1056_v52 = vpack.c.bf16 %v317_v44, %v316_v43  ;;  %v319_v57 = vld [vmem:[#allocation5 + $0xe8] sm:$0xff]  ;;  %p1331_p1 = pnand %p1330_p12, %p1324_p3 }
  0x75   : > { %1047 = vmatpush3.bf16.msra.mxu0 %v1046_v28  ;;  %v332_v48 = vld [vmem:[#allocation5 + $0x150] sm:$0xff]  ;;  %409 = vmatprep.mubr.f32.mxu0 %v1629_v46  ;;  %v1633_v50 = vld [vmem:[%s1618_s12 + $0x8] sm:$0xff]  ;;  %v284_v51 = vrot.slane %v1629_v46, 1  ;;  %v318_v56 = vld [vmem:[#allocation5 + $0xe0] sm:$0xff]  ;;  %v277_v22 = vrot.slane %v1629_v46, 7 }
  0x76   : > { %1049 = vmatprep.subr.bf16.mxu0 %v1048_v31  ;;  %v300_v53 = vld [vmem:[#allocation5 + $0x50] sm:$0xff]  ;;  %v301_v54 = vld [vmem:[#allocation5 + $0x58] sm:$0xff]  ;;  %v285_v55 = vrot.slane %v1633_v50, 1  ;;  %v1088_v58 = vpack.c.bf16 %v333_v49, %v332_v48  ;;  %v334_v61 = vld [vmem:[#allocation5 + $0x160] sm:$0xff]  ;;  %v1060_v63 = vpack.c.bf16 %v319_v57, %v318_v56  ;;  %v278_v25 = vrot.slane %v1633_v50, 7 }
  0x77   : > { %1079 = vmatpush3.bf16.msra.mxu1 %v1076_v27  ;;  %v1058_v60 = vpack.c.bf16 %v301_v54, %v300_v53  ;;  %v335_v62 = vld [vmem:[#allocation5 + $0x168] sm:$0xff]  ;;  %v302_v0 = vld [vmem:[#allocation5 + $0x60] sm:$0xff]  ;;  %v320_v2 = vld [vmem:[#allocation5 + $0xf0] sm:$0xff] }
  0x78   : > { %1081 = vmatprep.subr.bf16.mxu1 %v1080_v36  ;;  %v286_v59 = vsel %vm283_vm0, %v284_v51, %v285_v55  ;;  %v303_v1 = vld [vmem:[#allocation5 + $0x68] sm:$0xff]  ;;  %v321_v3 = vld [vmem:[#allocation5 + $0xf8] sm:$0xff]  ;;  %v1092_v4 = vpack.c.bf16 %v335_v62, %v334_v61  ;;  %v336_v6 = vld [vmem:[#allocation5 + $0x170] sm:$0xff]  ;;  %v279_v35 = vsel %vm276_vm1, %v277_v22, %v278_v25 }
  0x79   : > { %1051 = vmatpush3.bf16.msra.mxu0 %v1050_v37  ;;  %998 = vmatprep.mubr.f32.mxu1 %v286_v59  ;;  %v1062_v5 = vpack.c.bf16 %v303_v1, %v302_v0  ;;  %v337_v7 = vld [vmem:[#allocation5 + $0x178] sm:$0xff]  ;;  %v1064_v8 = vpack.c.bf16 %v321_v3, %v320_v2  ;;  %v304_v9 = vld [vmem:[#allocation5 + $0x70] sm:$0xff]  ;;  %v527_v11 = vld [vmem:[#allocation7 + $0x80] sm:$0xff] }
  0x7a   : > { %1053 = vmatprep.subr.bf16.mxu0 %v1052_v40  ;;  %v305_v10 = vld [vmem:[#allocation5 + $0x78] sm:$0xff]  ;;  %v528_v12 = vld [vmem:[#allocation7 + $0x88] sm:$0xff]  ;;  %v1096_v13 = vpack.c.bf16 %v337_v7, %v336_v6  ;;  %v543_v15 = vld [vmem:[#allocation7 + $0x100] sm:$0xff] }
  0x7b   : > { %1083 = vmatpush3.bf16.msra.mxu1 %v1080_v36  ;;  %v1066_v14 = vpack.c.bf16 %v305_v10, %v304_v9  ;;  %v544_v16 = vld [vmem:[#allocation7 + $0x108] sm:$0xff]  ;;  %v1100_v17 = vpack.c.bf16 %v528_v12, %v527_v11  ;;  %v511_v18 = vld [vmem:[#allocation7] sm:$0xff]  ;;  %v529_v20 = vld [vmem:[#allocation7 + $0x90] sm:$0xff] }
  0x7c   : > { %1085 = vmatprep.subr.bf16.mxu1 %v1084_v45  ;;  %v512_v19 = vld [vmem:[#allocation7 + $0x8] sm:$0xff]  ;;  %v530_v21 = vld [vmem:[#allocation7 + $0x98] sm:$0xff]  ;;  %v1132_v23 = vpack.c.bf16 %v544_v16, %v543_v15  ;;  %vm1642_vm2 = vmneg %vm276_vm1 }
  0x7d   : > { %1055 = vmatpush3.bf16.msra.mxu0 %v1054_v47  ;;  %v1102_v26 = vpack.c.bf16 %v512_v19, %v511_v18  ;;  %v545_v27 = vld [vmem:[#allocation7 + $0x110] sm:$0xff]  ;;  %v546_v28 = vld [vmem:[#allocation7 + $0x118] sm:$0xff]  ;;  %v1104_v29 = vpack.c.bf16 %v530_v21, %v529_v20  ;;  %v531_v32 = vld [vmem:[#allocation7 + $0xa0] sm:$0xff] }
  0x7e   : > { %1057 = vmatprep.subr.bf16.mxu0 %v1056_v52  ;;  %v513_v30 = vld [vmem:[#allocation7 + $0x10] sm:$0xff]  ;;  %v514_v31 = vld [vmem:[#allocation7 + $0x18] sm:$0xff]  ;;  %v532_v33 = vld [vmem:[#allocation7 + $0xa8] sm:$0xff]  ;;  %v1136_v34 = vpack.c.bf16 %v546_v28, %v545_v27 }
  0x7f   : > { %1087 = vmatpush3.bf16.msra.mxu1 %v1084_v45  ;;  %v1106_v36 = vpack.c.bf16 %v514_v31, %v513_v30  ;;  %v547_v37 = vld [vmem:[#allocation7 + $0x120] sm:$0xff]  ;;  %v548_v38 = vld [vmem:[#allocation7 + $0x128] sm:$0xff]  ;;  %v1108_v39 = vpack.c.bf16 %v532_v33, %v531_v32  ;;  %v533_v42 = vld [vmem:[#allocation7 + $0xb0] sm:$0xff] }
  0x80   : > { %1089 = vmatprep.subr.bf16.mxu1 %v1088_v58  ;;  %v515_v40 = vld [vmem:[#allocation7 + $0x20] sm:$0xff]  ;;  %v516_v41 = vld [vmem:[#allocation7 + $0x28] sm:$0xff]  ;;  %v534_v43 = vld [vmem:[#allocation7 + $0xb8] sm:$0xff]  ;;  %v1140_v44 = vpack.c.bf16 %v548_v38, %v547_v37 }
  0x81   : > { %1059 = vmatpush3.bf16.msra.mxu0 %v1058_v60  ;;  %v1110_v45 = vpack.c.bf16 %v516_v41, %v515_v40  ;;  %v549_v47 = vld [vmem:[#allocation7 + $0x130] sm:$0xff]  ;;  %v550_v48 = vld [vmem:[#allocation7 + $0x138] sm:$0xff]  ;;  %v1112_v49 = vpack.c.bf16 %v534_v43, %v533_v42  ;;  %v535_v53 = vld [vmem:[#allocation7 + $0xc0] sm:$0xff] }
  0x82   : > { %1061 = vmatprep.subr.bf16.mxu0 %v1060_v63  ;;  %v517_v51 = vld [vmem:[#allocation7 + $0x30] sm:$0xff]  ;;  %v518_v52 = vld [vmem:[#allocation7 + $0x38] sm:$0xff]  ;;  %v536_v54 = vld [vmem:[#allocation7 + $0xc8] sm:$0xff] }
  0x83   : > { %1091 = vmatpush3.bf16.msra.mxu1 %v1088_v58  ;;  %v1114_v56 = vpack.c.bf16 %v518_v52, %v517_v51  ;;  %v1116_v57 = vpack.c.bf16 %v536_v54, %v535_v53  ;;  %v519_v58 = vld [vmem:[#allocation7 + $0x40] sm:$0xff]  ;;  %v520_v59 = vld [vmem:[#allocation7 + $0x48] sm:$0xff]  ;;  %v537_v61 = vld [vmem:[#allocation7 + $0xd0] sm:$0xff] }
  0x84   : > { %1093 = vmatprep.subr.bf16.mxu1 %v1092_v4  ;;  %v1118_v60 = vpack.c.bf16 %v520_v59, %v519_v58  ;;  %v538_v62 = vld [vmem:[#allocation7 + $0xd8] sm:$0xff]  ;;  %v521_v0 = vld [vmem:[#allocation7 + $0x50] sm:$0xff]  ;;  %v551_v3 = vld [vmem:[#allocation7 + $0x140] sm:$0xff] }
  0x85   : > { %1063 = vmatpush3.bf16.msra.mxu0 %v1062_v5  ;;  %v1120_v63 = vpack.c.bf16 %v538_v62, %v537_v61  ;;  %v522_v1 = vld [vmem:[#allocation7 + $0x58] sm:$0xff]  ;;  %v539_v6 = vld [vmem:[#allocation7 + $0xe0] sm:$0xff]  ;;  %v540_v7 = vld [vmem:[#allocation7 + $0xe8] sm:$0xff] }
  0x86   : > { %1065 = vmatprep.subr.bf16.mxu0 %v1064_v8  ;;  %v1122_v2 = vpack.c.bf16 %v522_v1, %v521_v0  ;;  %v1124_v8 = vpack.c.bf16 %v540_v7, %v539_v6  ;;  %v523_v9 = vld [vmem:[#allocation7 + $0x60] sm:$0xff]  ;;  %v524_v10 = vld [vmem:[#allocation7 + $0x68] sm:$0xff]  ;;  %v553_v12 = vld [vmem:[#allocation7 + $0x150] sm:$0xff] }
  0x87   : > { %1095 = vmatpush3.bf16.msra.mxu1 %v1092_v4  ;;  %v552_v4 = vld [vmem:[#allocation7 + $0x148] sm:$0xff]  ;;  %v1126_v11 = vpack.c.bf16 %v524_v10, %v523_v9  ;;  %v541_v15 = vld [vmem:[#allocation7 + $0xf0] sm:$0xff]  ;;  %v542_v16 = vld [vmem:[#allocation7 + $0xf8] sm:$0xff] }
  0x88   : > { %1097 = vmatprep.subr.bf16.mxu1 %v1096_v13  ;;  %v1148_v5 = vpack.c.bf16 %v552_v4, %v551_v3  ;;  %v525_v18 = vld [vmem:[#allocation7 + $0x70] sm:$0xff]  ;;  %v526_v19 = vld [vmem:[#allocation7 + $0x78] sm:$0xff]  ;;  %v555_v21 = vld [vmem:[#allocation7 + $0x160] sm:$0xff] }
  0x89   : > { %1067 = vmatpush3.bf16.msra.mxu0 %v1066_v14  ;;  %v1130_v20 = vpack.c.bf16 %v526_v19, %v525_v18  ;;  %v557_v25 = vld [vmem:[#allocation7 + $0x170] sm:$0xff]  ;;  %v839_v30 = vld [vmem:[%s1721_s2] ss:$0 sm:$0xff] }
  0x8a   : > { %1101 = vmatprep.subr.bf16.mxu0 %v1100_v17  ;;  %v1128_v17 = vpack.c.bf16 %v542_v16, %v541_v15  ;;  %v843_v24 = vld [vmem:[%s1723_s4] ss:$0 sm:$0xff] }
  0x8b   : > { %1099 = vmatpush3.bf16.msra.mxu1 %v1096_v13  ;;  %v554_v13 = vld [vmem:[#allocation7 + $0x158] sm:$0xff] }
  0x8c   : > { %841 = vmatmul.mubr.msk.f32.vlgmr.msra.gmra.mrb[0].mxu0 %vm1642_vm2, %v277_v22  ;;  %1133 = vmatprep.subr.bf16.mxu1 %v1132_v23  ;;  %v1152_v14 = vpack.c.bf16 %v554_v13, %v553_v12  ;;  %v556_v22 = vld [vmem:[#allocation7 + $0x168] sm:$0xff] }
  0x8d   : > { %414 = vmatprep.mubr.f32.mxu0 %v1633_v50  ;;  %1103 = vmatpush3.bf16.msra.mxu0 %v1102_v26  ;;  %v558_v26 = vld [vmem:[#allocation7 + $0x178] sm:$0xff] }
  0x8e   : > { %999 = vmatmul.mubr.msk.f32.vlgmr.msra.gmra.mrb[0].mxu1 %vm283_vm0, %v285_v55  ;;  %1105 = vmatprep.subr.bf16.mxu0 %v1104_v29  ;;  %v1144_v55 = vpack.c.bf16 %v550_v48, %v549_v47  ;;  %v1160_v27 = vpack.c.bf16 %v558_v26, %v557_v25 }
  0x8f   : > { %1135 = vmatpush3.bf16.msra.mxu1 %v1132_v23  ;;  %v1156_v23 = vpack.c.bf16 %v556_v22, %v555_v21 }
  0x90   : > { %415 = vmatmul.mubr.f32.gmra.mrb[2].mxu0 %v279_v35  ;;  %1137 = vmatprep.subr.bf16.mxu1 %v1136_v34 }
  0x91   : > { %1107 = vmatpush3.bf16.msra.mxu0 %v1106_v36 }
  0x92   : > { %1109 = vmatprep.subr.bf16.mxu0 %v1108_v39 }
  0x93   : > { %1139 = vmatpush3.bf16.msra.mxu1 %v1136_v34 }
  0x94   : > { %1141 = vmatprep.subr.bf16.mxu1 %v1140_v44 }
  0x95   : > { %1111 = vmatpush3.bf16.msra.mxu0 %v1110_v45 }
  0x96   : > { %1113 = vmatprep.subr.bf16.mxu0 %v1112_v49 }
  0x97   : > { %1143 = vmatpush3.bf16.msra.mxu1 %v1140_v44 }
  0x98   : > { %1145 = vmatprep.subr.bf16.mxu1 %v1144_v55 }
  0x99   : > { %1115 = vmatpush3.bf16.msra.mxu0 %v1114_v56 }
  0x9a   : > { %1117 = vmatprep.subr.bf16.mxu0 %v1116_v57 }
  0x9b   : > { %1147 = vmatpush3.bf16.msra.mxu1 %v1144_v55 }
  0x9c   : > { %1149 = vmatprep.subr.bf16.mxu1 %v1148_v5 }
  0x9d   : > { %1119 = vmatpush3.bf16.msra.mxu0 %v1118_v60 }
  0x9e   : > { %1121 = vmatprep.subr.bf16.mxu0 %v1120_v63 }
  0x9f   : > { %1151 = vmatpush3.bf16.msra.mxu1 %v1148_v5 }
  0xa0   : > { %1153 = vmatprep.subr.bf16.mxu1 %v1152_v14 }
  0xa1   : > { %1123 = vmatpush3.bf16.msra.mxu0 %v1122_v2 }
  0xa2   : > { %1125 = vmatprep.subr.bf16.mxu0 %v1124_v8 }
  0xa3   : > { %1155 = vmatpush3.bf16.msra.mxu1 %v1152_v14 }
  0xa4   : > { %1157 = vmatprep.subr.bf16.mxu1 %v1156_v23 }
  0xa5   : > { %1127 = vmatpush3.bf16.msra.mxu0 %v1126_v11 }
  0xa6   : > { %1129 = vmatprep.subr.bf16.mxu0 %v1128_v17 }
  0xa7   : > { %1159 = vmatpush3.bf16.msra.mxu1 %v1156_v23 }
  0xa8   : > { %1161 = vmatprep.subr.bf16.mxu1 %v1160_v27 }
  0xa9   : > { %1131 = vmatpush3.bf16.msra.mxu0 %v1130_v20 }
  0xab   : > { %1163 = vmatpush3.bf16.msra.mxu1 %v1160_v27 }
 0x15f   : > { %v886_v28 = vpop.f32.mrb[0].mxu0 }
 0x160   : > { %v887_v29 = vpop.f32.mrb[1].mxu0 }
 0x161   : > { %v888_v31 = vadd.f32 %v887_v29, %v886_v28  ;;  %v1000_v32 = vpop.f32.mrb[0].mxu1 }
 0x162   : > { %v486_v33 = vpop.f32.mrb[1].mxu1 }
 0x163   : > { %v889_v34 = vpop.f32.mrb[2].mxu0  ;;  %v412_v35 = vadd.f32 %v888_v31, %v839_v30 }
 0x164   : > { %v890_v36 = vpop.f32.mrb[3].mxu0 }
 0x165   : > { %v891_v37 = vadd.f32 %v890_v36, %v889_v34  ;;  %v487_v38 = vadd.f32 %v486_v33, %v412_v35 }
 0x167   : > { %v417_v39 = vadd.f32 %v891_v37, %v839_v30  ;;  %v495_v40 = vmax.f32 %v487_v38, 0.0 }
 0x169   : > { %v499_v41 = vrot.slane %v495_v40, 7  ;;  %630 = vmatprep.mubr.f32.mxu0 %v495_v40  ;;  %v492_v42 = vadd.f32 %v1000_v32, %v417_v39  ;;  %v505_v44 = vrot.slane %v495_v40, 1 }
 0x16b   : > { %845 = vmatmul.mubr.msk.f32.vlgmr.msra.gmra.mrb[4].mxu0 %vm1642_vm2, %v499_v41  ;;  %v496_v43 = vmax.f32 %v492_v42, 0.0 }
 0x16d   : > { %635 = vmatprep.mubr.f32.mxu0 %v496_v43  ;;  %v500_v45 = vrot.slane %v496_v43, 7  ;;  %v506_v47 = vrot.slane %v496_v43, 1 }
 0x16f   : > { %v501_v48 = vsel %vm276_vm1, %v499_v41, %v500_v45  ;;  %v507_v49 = vsel %vm283_vm0, %v505_v44, %v506_v47 }
 0x170   : > { %636 = vmatmul.mubr.f32.gmra.mrb[6].mxu0 %v501_v48  ;;  %1033 = vmatprep.mubr.f32.mxu1 %v507_v49 }
 0x171   : > { %1034 = vmatmul.mubr.msk.f32.vlgmr.msra.gmra.mrb[2].mxu1 %vm283_vm0, %v506_v47 }
 0x23e   : > { %v942_v51 = vpop.f32.mrb[4].mxu0 }
 0x23f   : > { %v943_v52 = vpop.f32.mrb[5].mxu0 }
 0x240   : > { %v944_v53 = vadd.f32 %v943_v52, %v942_v51 }
 0x242   : > { %v633_v57 = vadd.f32 %v944_v53, %v843_v24 }
 0x243   : > { %v945_v54 = vpop.f32.mrb[6].mxu0 }
 0x244   : > { %v946_v55 = vpop.f32.mrb[7].mxu0  ;;  %v1035_v56 = vpop.f32.mrb[2].mxu1 }
 0x245   : > { %v947_v58 = vadd.f32 %v946_v55, %v945_v54  ;;  %v707_v59 = vpop.f32.mrb[3].mxu1 }
 0x246   : > { %v708_v60 = vadd.f32 %v707_v59, %v633_v57 }
 0x247   : > { %v638_v61 = vadd.f32 %v947_v58, %v843_v24 }
 0x248   : > { %v716_v62 = vadd.f32 %v708_v60, %v1629_v46 }
 0x249   : > { %v713_v63 = vadd.f32 %v1035_v56, %v638_v61 }
 0x24a   : > { %718 = vst [vmem:[%s271_s10] sm:$0xff] %v716_v62 }
 0x24b   : > { %v717_v0 = vadd.f32 %v713_v63, %v1633_v50 }
 0x24d   : > { %719 = vst [vmem:[%s271_s10 + $0x8] sm:$0xff] %v717_v0 }
 0x24e   : > { %1334 = shalt.err (!%p1331_p1)
}
 0x24f   : > { %s1335_s12 = scalar_lea.hbm %s1674_s11, 256  ;;  %s1339_s15 = scalar_lea.hbm %s1724_s5, 512 }
 0x250   : > { %p1336_p13 = scmp.ne.s32.totalorder %s1674_s11, %s1335_s12  ;;  %p1340_p4 = scmp.lt.u32.totalorder %s1674_s11, %s1724_s5 }
 0x251   : > { %p1341_p5 = scmp.lt.u32.totalorder %s1339_s15, %s1335_s12  ;;  %p1343_p11 = scmp.lt.u32.totalorder %s1335_s12, %s1674_s11 }
 0x252   : > { %p1337_p6 = pnand %p1336_p13, %p1740_p0 }
 0x253   : > { %p1342_p8 = por %p1341_p5, %p1340_p4 }
 0x254   : > { %p1338_p10 = pneg %p1337_p6 }
 0x255   : > { %p1344_p2 = por %p1343_p11, %p1342_p8 }
 0x257   : > { %p1345_p3 = pnand %p1344_p2, %p1338_p10 }
 0x259   : > { %1348 = shalt.err (!%p1345_p3)
}
 0x25a   : > { %s1399_s13 = smov 128   ;;  %s1400_s9 = smov 8  }
 0x25b   : > { %1174 = dma.vmem_to_hbm [thread:$0]  (%p1740_p0), %s1669_s28, 256, %s1674_s11, %s721_s17, %s1399_s13, %s1399_s13, %s1400_s9  }
 0x25c PF: > { %s749_s30 = sand.u32 1, %s1379_s18   ;;  %p1741_p7 = scmp.ne.s32.totalorder %s1729_s25, 0 }
 0x25d   : > { %p1742_p9 = scmp.ge.s32.totalorder %s1391_s21, 2  ;;  %s750_s7 = scalar_lea.sflag [#allocation4], %s749_s30 }
 0x25f   : > { %p1188_p12 = pnand %p1742_p9, %p1741_p7 }
 0x261   : > { %1374 = dma.done.wait (!%p1188_p12), %s750_s7, 256  }
 0x262   : > { %1376 = vsyncadd (!%p1188_p12), %s750_s7, 4294967040  ;;  %p19_p1 = scmp.ge.s32.totalorder %s1547_s29, 4   ;;  %s1743_s18 = smov %s1383_s19 }
 0x263   : > { %s1744_s19 = smov %s1387_s20  ;;  %s1745_s20 = smov %s1563_s27 }
 0x264   : > { %s1746_s21 = smov %s1547_s29  ;;  %21 = sbr.rel (!%p19_p1) target bundleno = 6 (0x6), region = 93 }
 0x26b   :  { %755 = vsyncpa [#allocation3], 1 }
 0x26c   :  { %757 = vsyncpa [#allocation3 + $0x1], 1 }
 0x26d   :  { %758 = vsyncpa [#allocation6], 1 }
 0x26e   :  { %759 = vsyncpa [#allocation4], 1 }
 0x26f   :  { %761 = vsyncpa [#allocation4 + $0x1], 1 }

</bundles_post_ra>
